<compile_context>
chip_gen: v6e
topology: v6e:2x2x1
jax: 0.10.0
libtpu: 0.0.40
codegen_flags: <defaults>
</compile_context>

<pallas_src>
import functools
import math

import jax
import jax.numpy as jnp
from jax.experimental import pallas as pl
from jax.experimental.pallas import tpu as pltpu


def _rotary_kernel(pos_ref, inv_ref, out_ref, *, r):
    """pos_ref: (T, r) f32, inv_ref: (1, dim) f32, out_ref: (T, r*dim) f32.

    Packed output row i holds r consecutive original rows:
        out[i, k*dim:(k+1)*dim] = pos[i, k] * [inv_freq, inv_freq]
    r VPU broadcast-multiplies + one lane-dim concat + one lane-dense store.
    """
    p = pos_ref[...]
    f = inv_ref[...]
    if r == 1:
        out_ref[...] = p * f
    else:
        out_ref[...] = jnp.concatenate(
            [p[:, k:k + 1] * f for k in range(r)], axis=-1
        )


def _choose_row_packing(dim):
    """Pick r so the packed row width W = r*dim is a lane-dense multiple of 128."""
    if dim % 128 == 0 or 128 % dim == 0:
        base = (dim * 128) // math.gcd(dim, 128)   # lcm(dim, 128)
        w = base * max(1, 512 // base)             # aim for >= 512 lanes per store row
        return w // dim, w
    # TODO(synk): dims that neither divide nor are divided by 128 fall back to
    # masked (partial-lane) stores; could be handled with explicit lane padding.
    return 1, dim


def _choose_tile_rows(n_rows, row_width, r, target_block_bytes):
    """Packed rows per grid step, from a per-buffer VMEM byte budget."""
    # Per packed row, per buffer: W*4 B of output + 128*4 B of lane-padded pos.
    row_bytes = row_width * 4 + 128 * 4
    tile = max(1, min(n_rows, target_block_bytes // row_bytes))
    if tile >= n_rows:
        return n_rows
    tile = max(8, (tile // 8) * 8)                 # (8, 128) sublane constraint
    if tile >= n_rows:
        return n_rows
    num_tiles = -(-n_rows // tile)
    if num_tiles > 1 and num_tiles % 2 == 1:       # even grid -> balanced v7x TCs
        num_tiles += 1
        tile = max(8, ((-(-n_rows // num_tiles) + 7) // 8) * 8)
        if tile >= n_rows:
            return n_rows
    return tile


def rotary_embedding(pos, inv_freq, *, target_block_bytes=4 << 20,
                     xla_fallback_elems=8192):
    """pos: f[N], inv_freq: f32[dim//2] -> f32[N, dim] (== concat([p⊗f, p⊗f], -1))."""
    n = pos.shape[0]
    half = inv_freq.shape[0]
    dim = 2 * half

    pos_f = pos.astype(jnp.float32)
    inv_dup = jnp.concatenate([inv_freq, inv_freq]).astype(jnp.float32)   # (dim,)

    # Tiny tables: pallas_call launch/pipeline setup dwarfs the work -> let XLA fuse.
    if n * dim <= xla_fallback_elems:
        return pos_f[:, None] * inv_dup[None, :]

    r, w = _choose_row_packing(dim)

    # Pad N to a multiple of r, pack r rows per packed row (row-major view).
    n_pad = r * (-(-n // r))
    if n_pad != n:
        pos_f = jnp.pad(pos_f, (0, n_pad - n))
    n_rows = n_pad // r
    pos_packed = pos_f.reshape(n_rows, r)
    inv_row = inv_dup.reshape(1, dim)

    tile_rows = _choose_tile_rows(n_rows, w, r, target_block_bytes)
    grid = (-(-n_rows // tile_rows),)

    out_packed = pl.pallas_call(
        functools.partial(_rotary_kernel, r=r),
        out_shape=jax.ShapeDtypeStruct((n_rows, w), jnp.float32),
        grid=grid,
        in_specs=[
            pl.BlockSpec((tile_rows, r), lambda i: (i, 0)),   # packed positions
            pl.BlockSpec((1, dim), lambda i: (0, 0)),         # duplicated inv_freq, resident
        ],
        out_specs=pl.BlockSpec((tile_rows, w), lambda i: (i, 0)),
        compiler_params=pltpu.CompilerParams(
            # No-op on single-TC v5e/v6e; shards row-tiles across the two v7x TCs.
            dimension_semantics=("parallel",),
        ),
    )(pos_packed, inv_row)

    out = out_packed.reshape(n_pad, dim)    # free row-major bitcast
    return out[:n] if n_pad != n else out


def make_inv_freq(dim, theta=32768):
    # Matches: 1.0 / theta ** (torch.arange(0, dim, 2).float() / dim)
    return 1.0 / (theta ** (jnp.arange(0, dim, 2, dtype=jnp.float32) / dim))


def _reference(pos, inv_freq):
    freqs = jnp.einsum("i,j->ij", pos.astype(jnp.float32), inv_freq)
    return jnp.concatenate([freqs, freqs], axis=-1)


if __name__ == "__main__":
    key = jax.random.PRNGKey(0)
    k1, k2, k3 = jax.random.split(key, 3)

    # --- 1) Typical module shape (seq=8, dim=32): force the Pallas packed path ---
    dim, seq = 32, 8
    pos = jnp.floor(jax.random.uniform(k1, (seq,), minval=0.0, maxval=1024.0))
    inv_freq = make_inv_freq(dim)
    ref = _reference(pos, inv_freq)

    out = jax.block_until_ready(rotary_embedding(pos, inv_freq, xla_fallback_elems=0))
    assert out.shape == (seq, dim), out.shape
    assert jnp.allclose(out, ref, atol=1e-6, rtol=1e-6)

    # Same shape through the default dispatch (XLA fallback for tiny tables).
    out_small = jax.block_until_ready(rotary_embedding(pos, inv_freq))
    assert jnp.allclose(out_small, ref, atol=1e-6, rtol=1e-6)

    # --- 2) dim=64 (packed, r=8), long sequence -> multi-tile grid + partial tail ---
    dim2, n2 = 64, 50000
    pos2 = jnp.floor(jax.random.uniform(k2, (n2,), minval=0.0, maxval=65536.0))
    inv_freq2 = make_inv_freq(dim2)
    out2 = jax.block_until_ready(rotary_embedding(pos2, inv_freq2))
    ref2 = _reference(pos2, inv_freq2)
    assert out2.shape == (n2, dim2), out2.shape
    assert jnp.allclose(out2, ref2, atol=1e-5, rtol=1e-6)

    # --- 3) dim=512 (already lane-dense, r=1), two tiles ---
    dim3, n3 = 512, 2048
    pos3 = jnp.floor(jax.random.uniform(k3, (n3,), minval=0.0, maxval=65536.0))
    inv_freq3 = make_inv_freq(dim3)
    out3 = jax.block_until_ready(rotary_embedding(pos3, inv_freq3))
    ref3 = _reference(pos3, inv_freq3)
    assert out3.shape == (n3, dim3), out3.shape
    assert jnp.allclose(out3, ref3, atol=1e-5, rtol=1e-6)

    print("KERNEL_OK")
</pallas_src>

<mosaic_0001>
module attributes {stable_mosaic.version = 11 : i64} {
  func.func @_rotary_kernel(%arg0: i32, %arg1: memref<1x16xf32, #tpu.memory_space<vmem>>, %arg2: memref<1x32xf32, #tpu.memory_space<vmem>>, %arg3: memref<1x512xf32, #tpu.memory_space<vmem>>) attributes {dimension_semantics = [#tpu.dimension_semantics<parallel>], iteration_bounds = array<i64: 1>, scalar_prefetch = 0 : i64, scratch_operands = 0 : i64, tpu.core_type = #tpu.core_type<tc>, window_params = [{transform_indices = @transform_0, window_bounds = array<i64: 1, 16>}, {pipeline_mode = #tpu.pipeline_mode<synchronous>, transform_indices = @transform_1, window_bounds = array<i64: 1, 32>}, {transform_indices = @transform_2, window_bounds = array<i64: 1, 512>}]} {
    %c0 = arith.constant 0 : index
    %c0_0 = arith.constant 0 : index
    %0 = vector.load %arg1[%c0, %c0_0] : memref<1x16xf32, #tpu.memory_space<vmem>>, vector<1x16xf32>
    %c0_1 = arith.constant 0 : index
    %c0_2 = arith.constant 0 : index
    %1 = vector.load %arg2[%c0_1, %c0_2] : memref<1x32xf32, #tpu.memory_space<vmem>>, vector<1x32xf32>
    %2 = vector.extract_strided_slice %0 {offsets = [0, 0], sizes = [1, 1], strides = [1, 1]} : vector<1x16xf32> to vector<1x1xf32>
    %3 = vector.broadcast %2 : vector<1x1xf32> to vector<1x32xf32>
    %4 = arith.mulf %3, %1 : vector<1x32xf32>
    %5 = vector.extract_strided_slice %0 {offsets = [0, 1], sizes = [1, 1], strides = [1, 1]} : vector<1x16xf32> to vector<1x1xf32>
    %6 = vector.broadcast %5 : vector<1x1xf32> to vector<1x32xf32>
    %7 = arith.mulf %6, %1 : vector<1x32xf32>
    %8 = vector.extract_strided_slice %0 {offsets = [0, 2], sizes = [1, 1], strides = [1, 1]} : vector<1x16xf32> to vector<1x1xf32>
    %9 = vector.broadcast %8 : vector<1x1xf32> to vector<1x32xf32>
    %10 = arith.mulf %9, %1 : vector<1x32xf32>
    %11 = vector.extract_strided_slice %0 {offsets = [0, 3], sizes = [1, 1], strides = [1, 1]} : vector<1x16xf32> to vector<1x1xf32>
    %12 = vector.broadcast %11 : vector<1x1xf32> to vector<1x32xf32>
    %13 = arith.mulf %12, %1 : vector<1x32xf32>
    %14 = vector.extract_strided_slice %0 {offsets = [0, 4], sizes = [1, 1], strides = [1, 1]} : vector<1x16xf32> to vector<1x1xf32>
    %15 = vector.broadcast %14 : vector<1x1xf32> to vector<1x32xf32>
    %16 = arith.mulf %15, %1 : vector<1x32xf32>
    %17 = vector.extract_strided_slice %0 {offsets = [0, 5], sizes = [1, 1], strides = [1, 1]} : vector<1x16xf32> to vector<1x1xf32>
    %18 = vector.broadcast %17 : vector<1x1xf32> to vector<1x32xf32>
    %19 = arith.mulf %18, %1 : vector<1x32xf32>
    %20 = vector.extract_strided_slice %0 {offsets = [0, 6], sizes = [1, 1], strides = [1, 1]} : vector<1x16xf32> to vector<1x1xf32>
    %21 = vector.broadcast %20 : vector<1x1xf32> to vector<1x32xf32>
    %22 = arith.mulf %21, %1 : vector<1x32xf32>
    %23 = vector.extract_strided_slice %0 {offsets = [0, 7], sizes = [1, 1], strides = [1, 1]} : vector<1x16xf32> to vector<1x1xf32>
    %24 = vector.broadcast %23 : vector<1x1xf32> to vector<1x32xf32>
    %25 = arith.mulf %24, %1 : vector<1x32xf32>
    %26 = vector.extract_strided_slice %0 {offsets = [0, 8], sizes = [1, 1], strides = [1, 1]} : vector<1x16xf32> to vector<1x1xf32>
    %27 = vector.broadcast %26 : vector<1x1xf32> to vector<1x32xf32>
    %28 = arith.mulf %27, %1 : vector<1x32xf32>
    %29 = vector.extract_strided_slice %0 {offsets = [0, 9], sizes = [1, 1], strides = [1, 1]} : vector<1x16xf32> to vector<1x1xf32>
    %30 = vector.broadcast %29 : vector<1x1xf32> to vector<1x32xf32>
    %31 = arith.mulf %30, %1 : vector<1x32xf32>
    %32 = vector.extract_strided_slice %0 {offsets = [0, 10], sizes = [1, 1], strides = [1, 1]} : vector<1x16xf32> to vector<1x1xf32>
    %33 = vector.broadcast %32 : vector<1x1xf32> to vector<1x32xf32>
    %34 = arith.mulf %33, %1 : vector<1x32xf32>
    %35 = vector.extract_strided_slice %0 {offsets = [0, 11], sizes = [1, 1], strides = [1, 1]} : vector<1x16xf32> to vector<1x1xf32>
    %36 = vector.broadcast %35 : vector<1x1xf32> to vector<1x32xf32>
    %37 = arith.mulf %36, %1 : vector<1x32xf32>
    %38 = vector.extract_strided_slice %0 {offsets = [0, 12], sizes = [1, 1], strides = [1, 1]} : vector<1x16xf32> to vector<1x1xf32>
    %39 = vector.broadcast %38 : vector<1x1xf32> to vector<1x32xf32>
    %40 = arith.mulf %39, %1 : vector<1x32xf32>
    %41 = vector.extract_strided_slice %0 {offsets = [0, 13], sizes = [1, 1], strides = [1, 1]} : vector<1x16xf32> to vector<1x1xf32>
    %42 = vector.broadcast %41 : vector<1x1xf32> to vector<1x32xf32>
    %43 = arith.mulf %42, %1 : vector<1x32xf32>
    %44 = vector.extract_strided_slice %0 {offsets = [0, 14], sizes = [1, 1], strides = [1, 1]} : vector<1x16xf32> to vector<1x1xf32>
    %45 = vector.broadcast %44 : vector<1x1xf32> to vector<1x32xf32>
    %46 = arith.mulf %45, %1 : vector<1x32xf32>
    %47 = vector.extract_strided_slice %0 {offsets = [0, 15], sizes = [1, 1], strides = [1, 1]} : vector<1x16xf32> to vector<1x1xf32>
    %48 = vector.broadcast %47 : vector<1x1xf32> to vector<1x32xf32>
    %49 = arith.mulf %48, %1 : vector<1x32xf32>
    %50 = tpu.concatenate %4, %7, %10, %13, %16, %19, %22, %25, %28, %31, %34, %37, %40, %43, %46, %49 in 1 : vector<1x32xf32>, vector<1x32xf32>, vector<1x32xf32>, vector<1x32xf32>, vector<1x32xf32>, vector<1x32xf32>, vector<1x32xf32>, vector<1x32xf32>, vector<1x32xf32>, vector<1x32xf32>, vector<1x32xf32>, vector<1x32xf32>, vector<1x32xf32>, vector<1x32xf32>, vector<1x32xf32>, vector<1x32xf32> -> vector<1x512xf32>
    %c0_3 = arith.constant 0 : index
    %c0_4 = arith.constant 0 : index
    %51 = vector.load %arg3[%c0_3, %c0_4] : memref<1x512xf32, #tpu.memory_space<vmem>>, vector<1x512xf32>
    tpu.vector_store %arg3[%c0_3, %c0_4], %50 {strides = array<i32>} : memref<1x512xf32, #tpu.memory_space<vmem>>, vector<1x512xf32>,
    return
  }
  func.func @transform_0(%arg0: i32) -> (i32, i32) {
    %c0_i32 = arith.constant 0 : i32
    %c0_i32_0 = arith.constant 0 : i32
    return %arg0, %c0_i32 : i32, i32
  }
  func.func @transform_1(%arg0: i32) -> (i32, i32) {
    %c0_i32 = arith.constant 0 : i32
    %c0_i32_0 = arith.constant 0 : i32
    %c0_i32_1 = arith.constant 0 : i32
    return %c0_i32, %c0_i32_0 : i32, i32
  }
  func.func @transform_2(%arg0: i32) -> (i32, i32) {
    %c0_i32 = arith.constant 0 : i32
    %c0_i32_0 = arith.constant 0 : i32
    return %arg0, %c0_i32 : i32, i32
  }
}

</mosaic_0001>

<bundles_post_ra>
// kernel: tpu_custom_call.1
= control target key start
LH: loop header
LB: loop body
LE: loop exit
PB: predicated region body
PF: predicated region fallthrough
CT: control target
= control target key end

     0   :  { %7 = vsyncpa [#allocation3], 0  ;;  %s526_s0 = inlined_call_operand.hbm [shape: f32[1,16], index: 0, kind: input, shape index: {}]   ;;  %s527_s1 = inlined_call_operand.vmem [shape: f32[1,32], index: 1, kind: input, shape index: {}]   ;;  %s528_s2 = inlined_call_operand.hbm [shape: f32[1,512], index: 2, kind: output, shape index: {}]  }
   0x1   :  { %8 = vsyncpa [#allocation4], 0  ;;  %s414_s9 = smov [#allocation2]  }
   0x2   :  { %s15_s10 = sshll.u32 %s414_s9, 4  ;;  %s16_s10 = int_to_ptr.vmem [resolvable:$true] %s15_s10 }
   0x3   :  { %s378_s11 = scalar_lea.vmem %s16_s10, 16  ;;  %s382_s12 = scalar_lea.vmem %s16_s10, 32 }
   0x4   :  { %p379_p0 = scmp.ne.s32.totalorder %s16_s10, %s378_s11  ;;  %p383_p1 = scmp.lt.s32.totalorder %s16_s10, %s16_s10 }
   0x5   :  { %p384_p2 = scmp.lt.s32.totalorder %s382_s12, %s378_s11 }
   0x7   :  { %p385_p3 = por %p384_p2, %p383_p1 }
   0x9   :  { %p386_p4 = pnand %p385_p3, %p379_p0 }
   0xb   :  { %389 = shalt.err (!%p386_p4)
}
   0xc   :  { %18 = dma.hbm_to_vmem [thread:$0]  %s526_s0, 16, %s16_s10, [#allocation3]  }
   0xd   :  { %410 = dma.done.wait [#allocation3], 16  }
   0xe   :  { %411 = vsyncadd [#allocation3], 4294967280  ;;  %v415_v0 = vmov 9   ;;  %v416_v1 = vmov 1   ;;  %v24_v2 = vld [vmem:[#allocation2] sm:$0x1]  ;;  %v31_v17 = vlaneseq }
   0xf   :  { %355 = vset.pattern.permute.xlu1 %v415_v0  ;;  %353 = vset.pattern.permute.xlu0 %v416_v1  ;;  %v417_v3 = vmov 13   ;;  %v418_v4 = vmov 5   ;;  %v419_v5 = vmov 2   ;;  %v420_v6 = vmov 6   ;;  %v463_v20 = vld [vmem:[%s527_s1] sm:$0x1] }
  0x10   :  { %109 = vperm.xlu1 %355, %v24_v2   ;;  %37 = vperm.xlu0 %353, %v24_v2   ;;  %v421_v7 = vmov 10   ;;  %v422_v8 = vmov 3   ;;  %v423_v9 = vmov 14   ;;  %v424_v10 = vmov 15   ;;  %s431_s1 = smov 32   ;;  %s432_s16 = smov 64  }
  0x11   :  { %v425_v11 = vmov 7   ;;  %v426_v12 = vmov 8   ;;  %v427_v13 = vmov 11   ;;  %v428_v14 = vmov 0   ;;  %s433_s17 = smov 96   ;;  %s435_s18 = smov [#allocation5]  }
  0x12   :  { %v429_v15 = vmov 4   ;;  %v430_v16 = vmov 12   ;;  %v455_v18 = vshrl.u32 %v31_v17, 7  ;;  %vm267_vm0 = vcmask 261120   ;;  %s322_s19 = sshll.u32 %s435_s18, 4  ;;  %s323_s19 = int_to_ptr.vmem [resolvable:$true] %s322_s19 }
  0x13   :  { %vm269_vm1 = vcmask 523264   ;;  %vm271_vm2 = vcmask 785408   ;;  %vm313_vm3 = vcmp.lt.s32.totalorder %v31_v17, 512  ;;  %s390_s20 = scalar_lea.vmem %s323_s19, 64  ;;  %p395_p6 = scmp.lt.s32.totalorder %s323_s19, %s323_s19 }
  0x14   :  { %356 = vset.pattern.permute.xlu1 %v417_v3  ;;  %354 = vset.pattern.permute.xlu0 %v418_v4  ;;  %v458_v19 = vsub.s32 0, %v455_v18  ;;  %p391_p5 = scmp.ne.s32.totalorder %s323_s19, %s390_s20  ;;  %p396_p7 = scmp.lt.s32.totalorder %s390_s20, %s390_s20 }
  0x15   :  { %145 = vperm.xlu1 %356, %v24_v2   ;;  %73 = vperm.xlu0 %354, %v24_v2  }
  0x16   :  { %p397_p8 = por %p396_p7, %p395_p6 }
  0x18   :  { %p398_p9 = pnand %p397_p8, %p391_p5 }
  0x19   :  { %357 = vset.pattern.permute.xlu1 %v419_v5  ;;  %358 = vset.pattern.permute.xlu0 %v420_v6 }
  0x1a   :  { %46 = vperm.xlu1 %357, %v24_v2   ;;  %82 = vperm.xlu0 %358, %v24_v2  }
  0x1e   :  { %359 = vset.pattern.permute.xlu1 %v421_v7  ;;  %361 = vset.pattern.permute.xlu0 %v422_v8 }
  0x1f   :  { %118 = vperm.xlu1 %359, %v24_v2   ;;  %55 = vperm.xlu0 %361, %v24_v2  }
  0x23   :  { %360 = vset.pattern.permute.xlu1 %v423_v9  ;;  %364 = vset.pattern.permute.xlu0 %v424_v10 }
  0x24   :  { %154 = vperm.xlu1 %360, %v24_v2   ;;  %163 = vperm.xlu0 %364, %v24_v2  }
  0x28   :  { %362 = vset.pattern.permute.xlu1 %v425_v11  ;;  %367 = vset.pattern.permute.xlu0 %v426_v12 }
  0x29   :  { %91 = vperm.xlu1 %362, %v24_v2   ;;  %100 = vperm.xlu0 %367, %v24_v2  }
  0x2d   :  { %363 = vset.pattern.permute.xlu1 %v427_v13  ;;  %369 = vset.pattern.permute.xlu0 %v424_v10 }
  0x2e   :  { %127 = vperm.xlu1 %363, %v24_v2  }
  0x32   :  { %365 = vset.pattern.permute.xlu1 %v428_v14 }
  0x33   :  { %28 = vperm.xlu1 %365, %v24_v2  }
  0x37   :  { %366 = vset.pattern.permute.xlu1 %v429_v15 }
  0x38   :  { %64 = vperm.xlu1 %366, %v24_v2  }
  0x3c   :  { %368 = vset.pattern.permute.xlu1 %v430_v16 }
  0x3d   :  { %136 = vperm.xlu1 %368, %v24_v2  }
  0x8b   :  { %v110_v21 = vpop.permute.xlu1 %109  ;;  %v38_v22 = vpop.permute.xlu0 %37 }
  0x8c   :  { %v115_v23 = vrot.slane %v110_v21, %v458_v19  ;;  %v43_v24 = vrot.slane %v38_v22, %v458_v19 }
  0x8e   :  { %v44_v25 = vmul.f32 %v43_v24, %v463_v20  ;;  %v116_v26 = vmul.f32 %v115_v23, %v463_v20 }
  0x90   :  { %v146_v27 = vpop.permute.xlu1 %145  ;;  %v74_v28 = vpop.permute.xlu0 %73  ;;  %v175_v29 = vrot.slane %v44_v25, %v458_v19  ;;  %v223_v33 = vrot.slane %v116_v26, %v458_v19 }
  0x91   :  { %v151_v30 = vrot.slane %v146_v27, %v458_v19  ;;  %v79_v31 = vrot.slane %v74_v28, %v458_v19 }
  0x92   :  { %176 = vrot.lane.b32.xlu1 %v175_v29, %s431_s1  ;;  %v434_v29 = vmov 1966171168  }
  0x93   :  { %v80_v32 = vmul.f32 %v79_v31, %v463_v20  ;;  %v152_v34 = vmul.f32 %v151_v30, %v463_v20  ;;  %v289_v30 = vunpack.c.l.s4 %v434_v29 }
  0x95   :  { %v47_v35 = vpop.permute.xlu1 %46  ;;  %v199_v36 = vrot.slane %v80_v32, %v458_v19  ;;  %v83_v37 = vpop.permute.xlu0 %82  ;;  %v247_v42 = vrot.slane %v152_v34, %v458_v19 }
  0x96   :  { %v52_v38 = vrot.slane %v47_v35, %v458_v19  ;;  %224 = vrot.lane.b32.xlu1 %v223_v33, %s431_s1  ;;  %v88_v39 = vrot.slane %v83_v37, %v458_v19 }
  0x97   :  { %200 = vrot.lane.b32.xlu0 %v199_v36, %s431_s1  ;;  %v290_v36 = vunpack.c.0.s8 %v289_v30 }
  0x98   :  { %v53_v40 = vmul.f32 %v52_v38, %v463_v20  ;;  %v89_v41 = vmul.f32 %v88_v39, %v463_v20 }
  0x9a   :  { %v119_v43 = vpop.permute.xlu1 %118  ;;  %v183_v44 = vrot.slane %v53_v40, %v458_v19  ;;  %v56_v45 = vpop.permute.xlu0 %55  ;;  %v207_v48 = vrot.slane %v89_v41, %v458_v19 }
  0x9b   :  { %v124_v46 = vrot.slane %v119_v43, %v458_v19  ;;  %248 = vrot.lane.b32.xlu0 %v247_v42, %s431_s1  ;;  %v61_v47 = vrot.slane %v56_v45, %v458_v19 }
  0x9c   :  { %184 = vrot.lane.b32.xlu1 %v183_v44, %s432_s16  ;;  %v293_v44 = vsub.s32 %v290_v36, %v455_v18 }
  0x9d   :  { %v125_v49 = vmul.f32 %v124_v46, %v463_v20  ;;  %v62_v50 = vmul.f32 %v61_v47, %v463_v20 }
  0x9f   :  { %v155_v51 = vpop.permute.xlu1 %154  ;;  %208 = vrot.lane.b32.xlu0 %v207_v48, %s432_s16  ;;  %v231_v52 = vrot.slane %v125_v49, %v458_v19  ;;  %v164_v54 = vpop.permute.xlu0 %163  ;;  %v191_v55 = vrot.slane %v62_v50, %v458_v19 }
  0xa0   :  { %v160_v53 = vrot.slane %v155_v51, %v458_v19  ;;  %v169_v57 = vrot.slane %v164_v54, %v458_v19 }
  0xa1   :  { %232 = vrot.lane.b32.xlu1 %v231_v52, %s432_s16 }
  0xa2   :  { %v161_v56 = vmul.f32 %v160_v53, %v463_v20  ;;  %v170_v0 = vmul.f32 %v169_v57, %v463_v20 }
  0xa4   :  { %v92_v58 = vpop.permute.xlu1 %91  ;;  %v255_v59 = vrot.slane %v161_v56, %v458_v19  ;;  %v101_v60 = vpop.permute.xlu0 %100  ;;  %v263_v5 = vrot.slane %v170_v0, %v458_v19 }
  0xa5   :  { %v97_v61 = vrot.slane %v92_v58, %v458_v19  ;;  %192 = vrot.lane.b32.xlu1 %v191_v55, %s433_s17  ;;  %v106_v62 = vrot.slane %v101_v60, %v458_v19 }
  0xa6   :  { %256 = vrot.lane.b32.xlu0 %v255_v59, %s432_s16 }
  0xa7   :  { %v98_v63 = vmul.f32 %v97_v61, %v463_v20  ;;  %v107_v1 = vmul.f32 %v106_v62, %v463_v20 }
  0xa9   :  { %v128_v2 = vpop.permute.xlu1 %127  ;;  %v215_v3 = vrot.slane %v98_v63, %v458_v19 }
  0xaa   :  { %v133_v4 = vrot.slane %v128_v2, %v458_v19 }
  0xab   :  { %216 = vrot.lane.b32.xlu0 %v215_v3, %s433_s17 }
  0xac   :  { %v134_v6 = vmul.f32 %v133_v4, %v463_v20 }
  0xae   :  { %v239_v7 = vrot.slane %v134_v6, %v458_v19  ;;  %v29_v8 = vpop.permute.xlu1 %28 }
  0xaf   :  { %264 = vrot.lane.b32.xlu0 %v263_v5, %s433_s17  ;;  %v34_v9 = vrot.slane %v29_v8, %v458_v19 }
  0xb0   :  { %240 = vrot.lane.b32.xlu1 %v239_v7, %s433_s17 }
  0xb1   :  { %v35_v10 = vmul.f32 %v34_v9, %v463_v20 }
  0xb3   :  { %v65_v11 = vpop.permute.xlu1 %64 }
  0xb4   :  { %v70_v12 = vrot.slane %v65_v11, %v458_v19 }
  0xb6   :  { %v71_v13 = vmul.f32 %v70_v12, %v463_v20 }
  0xb8   :  { %v137_v14 = vpop.permute.xlu1 %136 }
  0xb9   :  { %v142_v15 = vrot.slane %v137_v14, %v458_v19 }
  0xbb   :  { %v143_v16 = vmul.f32 %v142_v15, %v463_v20 }
 0x104   :  { %v177_v21 = vpop.permute.xlu1 %176 }
 0x105   :  { %v268_v32 = vsel %vm267_vm0, %v35_v10, %v177_v21 }
 0x108   :  { %v225_v23 = vpop.permute.xlu1 %224 }
 0x109   :  { %v201_v22 = vpop.permute.xlu0 %200  ;;  %v276_v40 = vsel %vm267_vm0, %v107_v1, %v225_v23 }
 0x10a   :  { %v273_v19 = vsel %vm267_vm0, %v71_v13, %v201_v22 }
 0x10d   :  { %v249_v24 = vpop.permute.xlu0 %248 }
 0x10e   :  { %v185_v25 = vpop.permute.xlu1 %184  ;;  %v279_v39 = vsel %vm267_vm0, %v143_v16, %v249_v24 }
 0x10f   :  { %v270_v20 = vsel %vm269_vm1, %v268_v32, %v185_v25 }
 0x111   :  { %v209_v26 = vpop.permute.xlu0 %208 }
 0x112   :  { %v274_v33 = vsel %vm269_vm1, %v273_v19, %v209_v26 }
 0x113   :  { %v233_v27 = vpop.permute.xlu1 %232 }
 0x114   :  { %v277_v43 = vsel %vm269_vm1, %v276_v40, %v233_v27 }
 0x117   :  { %v193_v31 = vpop.permute.xlu1 %192 }
 0x118   :  { %v257_v28 = vpop.permute.xlu0 %256  ;;  %v272_v35 = vsel %vm271_vm2, %v270_v20, %v193_v31 }
 0x119   :  { %v280_v41 = vsel %vm269_vm1, %v279_v39, %v257_v28 }
 0x11d   :  { %v217_v34 = vpop.permute.xlu0 %216 }
 0x11e   :  { %v275_v37 = vsel %vm271_vm2, %v274_v33, %v217_v34 }
 0x11f   :  { %v286_v38 = vcombine.low %v272_v35, %v275_v37 }
 0x121   :  { %v265_v42 = vpop.permute.xlu0 %264  ;;  %v294_v49 = vrot.slane %v286_v38, %v293_v44 }
 0x122   :  { %v281_v45 = vsel %vm271_vm2, %v280_v41, %v265_v42  ;;  %v241_v46 = vpop.permute.xlu1 %240 }
 0x123   :  { %v278_v47 = vsel %vm271_vm2, %v277_v43, %v241_v46 }
 0x124   :  { %v287_v48 = vcombine.low %v278_v47, %v281_v45 }
 0x126   :  { %v301_v50 = vrot.slane %v287_v48, %v293_v44 }
 0x128   :  { %v302_v51 = vcombine.low %v294_v49, %v301_v50 }
 0x12a   :  { %v309_v52 = vrot.slane %v302_v51, %v293_v44 }
 0x12c   :  { %315 = vst.msk [vmem:[#allocation5] sm:$0xf] %vm313_vm3, %v309_v52 }
 0x12d   :  { %401 = shalt.err (!%p398_p9)
}
 0x12e   :  { %325 = dma.vmem_to_hbm [thread:$0]  %s323_s19, 64, %s528_s2, [#allocation4]  }
 0x12f   :  { %412 = dma.done.wait [#allocation4], 64  }
 0x130   :  { %413 = vsyncadd [#allocation4], 4294967232 }
 0x131   :  { %329 = vsyncpa [#allocation3], 1 }
 0x132   :  { %330 = vsyncpa [#allocation4], 1 }

</bundles_post_ra>
